<compile_context>
chip_gen: v7x
topology: tpu7x:2x2x1
jax: 0.10.0
libtpu: 0.0.40
codegen_flags: <defaults>
</compile_context>

<pallas_src>
import jax
import jax.numpy as jnp
from jax.experimental import pallas as pl
from jax.experimental.pallas import tpu as pltpu

F_IN, F_HID, F_OUT = 51, 101, 51      # true feature widths (module spec)
F_HID_PAD = 128                       # hidden lane-padded to 128 (zero pad)
TM_MAX = 8192                         # max row tile; ~12 MiB double-buffered f32


def _round_up(x, m):
    return (x + m - 1) // m * m


# ----------------------------------------------------------------------------
# Fused classifier-head kernel:  relu((o1 + o2) @ W1 + b1) @ W3 + b3
# ----------------------------------------------------------------------------
def head_kernel(o1_ref, o2_ref, w1_ref, b1_ref, w3_ref, b3_ref, o_ref):
    x = o1_ref[...] + o2_ref[...]                            # (tm, 51)   f32, VPU
    h = jnp.dot(x, w1_ref[...],
                preferred_element_type=jnp.float32)          # (tm, 128)  f32, MXU
    h = jnp.maximum(h + b1_ref[...], 0.0)                    # bias + ReLU, f32
    y = jnp.dot(h, w3_ref[...],
                preferred_element_type=jnp.float32)          # (tm, 51)   f32, MXU
    o_ref[...] = y + b3_ref[...]                             # exact 51-wide store


def pack_head_params(w1, b1, w3, b3):
    """Pad the hidden dim (101 -> 128) once, at init time (hoisted out of forward).

    NOTE: zero padding is load-bearing: b1[101:] == 0 and W3[101:, :] == 0 keep
    the padded hidden lanes at 0 through ReLU, so they never leak into the output.
    """
    w1_p = jnp.zeros((F_IN, F_HID_PAD), jnp.float32).at[:, :F_HID].set(w1)
    b1_p = jnp.zeros((1, F_HID_PAD), jnp.float32).at[:, :F_HID].set(b1.reshape(1, -1))
    w3_p = jnp.zeros((F_HID_PAD, F_OUT), jnp.float32).at[:F_HID, :].set(w3)
    b3_p = b3.reshape(1, F_OUT).astype(jnp.float32)
    return w1_p, b1_p, w3_p, b3_p


def classifier_head(out1, out2, w1_p, b1_p, w3_p, b3_p):
    """out1, out2: (B, S, 51) float32.  Returns (B, S, 51) float32."""
    B, S, f_in = out1.shape
    rows = B * S

    # No lane padding and no row padding of the activations (free reshapes only):
    # a 51-wide last dim is legal because it equals the full array dim, and a
    # partial last row-block is safe (OOB writes dropped; compute is row-wise
    # independent, so unspecified padding rows never contaminate valid rows).
    o1 = out1.reshape(rows, f_in)
    o2 = out2.reshape(rows, f_in)

    # Row tile: ≥2 grid steps when rows allow (keeps both v7x TCs busy), capped
    # at TM_MAX to amortize the ~0.35 µs per-grid-step overhead.
    tm = max(8, min(TM_MAX, _round_up(pl.cdiv(rows, 2), 8)))
    grid = (pl.cdiv(rows, tm),)

    row_in_spec = pl.BlockSpec((tm, f_in), lambda i: (i, 0))        # double-buffered
    resident = lambda shape: pl.BlockSpec(shape, lambda i: (0, 0))  # stays in VMEM

    out = pl.pallas_call(
        head_kernel,
        out_shape=jax.ShapeDtypeStruct((rows, F_OUT), jnp.float32),  # exact 51 lanes
        grid=grid,
        in_specs=[
            row_in_spec,                 # out1 tile
            row_in_spec,                 # out2 tile
            resident(w1_p.shape),        # W1 (51, 128)   VMEM-resident
            resident(b1_p.shape),        # b1 (1, 128)
            resident(w3_p.shape),        # W3 (128, 51)
            resident(b3_p.shape),        # b3 (1, 51)
        ],
        out_specs=pl.BlockSpec((tm, F_OUT), lambda i: (i, 0)),
        compiler_params=pltpu.CompilerParams(
            dimension_semantics=("parallel",),   # 2 TCs on v7x; no-op on v5e/v6e
            vmem_limit_bytes=32 << 20),          # tm=8192 fits under v5e/v7x budgets
    )(o1, o2, w1_p, b1_p, w3_p, b3_p)

    return out.reshape(B, S, F_OUT)


# ----------------------------------------------------------------------------
# Deterministic stand-ins for the opaque constructor sub-modules (JAX glue)
# TODO(synk): the real spatial / lstm / temp modules are external nn.Modules
#             passed to __init__; they are modelled as simple projections.
# ----------------------------------------------------------------------------
def spatial_stub(keyframe, w_spatial):
    # 1x1 conv (NCHW): (B, C, H, W) -> (B, C_out, H, W)
    return jnp.einsum('bchw,co->bohw', keyframe, w_spatial)


def lstm_stub(seq_feat, w_lstm):
    # (B, S, C_out) -> (B, S, 51)   (recurrence omitted in the stub)
    return jnp.einsum('bsc,cf->bsf', seq_feat, w_lstm)


def temp_stub(clips, w_temp):
    # (B, S, D_clip) -> (B, S, 51)
    return jnp.einsum('bsd,df->bsf', clips, w_temp)


def linear_classifier_layer(keyframe, clips, params):
    sp = spatial_stub(keyframe, params['w_spatial'])          # (B, C_out, H, W)
    sp = jnp.transpose(sp, (0, 2, 3, 1))                      # permute(0,2,3,1)
    B, H, W, C = sp.shape
    sp = sp.reshape(B, H * W, C)                              # view(B, -1, C_out)
    out1 = lstm_stub(sp, params['w_lstm'])                    # (B, S, 51)
    out2 = temp_stub(clips, params['w_temp'])                 # (B, S, 51)
    # fused Pallas head: add -> linear1 -> relu -> linear3
    return classifier_head(out1, out2,
                           params['w1_p'], params['b1_p'],
                           params['w3_p'], params['b3_p'])


# ----------------------------------------------------------------------------
def init_params(key, c_in=4, c_out=16, d_clip=32):
    ks = jax.random.split(key, 7)

    def u(k, shape, fan_in):
        bound = 1.0 / jnp.sqrt(fan_in)
        return jax.random.uniform(k, shape, jnp.float32, -bound, bound)

    p = {
        'w_spatial': u(ks[0], (c_in, c_out), c_in),
        'w_lstm':    u(ks[1], (c_out, F_IN), c_out),
        'w_temp':    u(ks[2], (d_clip, F_IN), d_clip),
        # Linear(51, 101): stored as (in, out) -> (51, 101), bias (101,)
        'w1': u(ks[3], (F_IN, F_HID), F_IN),
        'b1': u(ks[4], (F_HID,), F_IN),
        # Linear(101, 51): (101, 51), bias (51,)
        'w3': u(ks[5], (F_HID, F_OUT), F_HID),
        'b3': u(ks[6], (F_OUT,), F_HID),
    }
    # hoisted out of the forward pass: pad / reshape the head weights once
    p['w1_p'], p['b1_p'], p['w3_p'], p['b3_p'] = pack_head_params(
        p['w1'], p['b1'], p['w3'], p['b3'])
    return p


if __name__ == "__main__":
    key = jax.random.PRNGKey(0)
    k_key, c_key, p_key = jax.random.split(key, 3)

    B, C, Hh, Ww = 2, 4, 8, 8          # keyframe: NCHW
    S = Hh * Ww                        # sequence length after flatten
    D_CLIP = 32

    keyframe = jax.random.normal(k_key, (B, C, Hh, Ww), jnp.float32)
    clips = jax.random.normal(c_key, (B, S, D_CLIP), jnp.float32)
    params = init_params(p_key, c_in=C, c_out=16, d_clip=D_CLIP)

    out = jax.block_until_ready(linear_classifier_layer(keyframe, clips, params))
    assert out.shape == (B, S, F_OUT)

    # ---- reference check (pure f32 module semantics) -------------------------
    sp = jnp.transpose(spatial_stub(keyframe, params['w_spatial']), (0, 2, 3, 1))
    sp = sp.reshape(B, -1, sp.shape[-1])
    o1 = lstm_stub(sp, params['w_lstm'])
    o2 = temp_stub(clips, params['w_temp'])
    x = o1 + o2

    hp = jax.lax.Precision.HIGHEST
    h_ref = jnp.maximum(
        jnp.einsum('bsf,fh->bsh', x, params['w1'], precision=hp) + params['b1'], 0.0)
    ref = jnp.einsum('bsh,ho->bso', h_ref, params['w3'], precision=hp) + params['b3']
    assert jnp.allclose(out, ref, atol=2e-3, rtol=2e-3)

    print("KERNEL_OK")
</pallas_src>

<mosaic_0001>
module attributes {stable_mosaic.version = 11 : i64} {
  func.func @head_kernel(%arg0: i32, %arg1: memref<64x51xf32, #tpu.memory_space<vmem>>, %arg2: memref<64x51xf32, #tpu.memory_space<vmem>>, %arg3: memref<51x128xf32, #tpu.memory_space<vmem>>, %arg4: memref<1x128xf32, #tpu.memory_space<vmem>>, %arg5: memref<128x51xf32, #tpu.memory_space<vmem>>, %arg6: memref<1x51xf32, #tpu.memory_space<vmem>>, %arg7: memref<64x51xf32, #tpu.memory_space<vmem>>) attributes {dimension_semantics = [#tpu.dimension_semantics<parallel>], iteration_bounds = array<i64: 2>, scalar_prefetch = 0 : i64, scratch_operands = 0 : i64, tpu.core_type = #tpu.core_type<tc>, window_params = [{transform_indices = @transform_0, window_bounds = array<i64: 64, 51>}, {transform_indices = @transform_1, window_bounds = array<i64: 64, 51>}, {pipeline_mode = #tpu.pipeline_mode<synchronous>, transform_indices = @transform_2, window_bounds = array<i64: 51, 128>}, {pipeline_mode = #tpu.pipeline_mode<synchronous>, transform_indices = @transform_3, window_bounds = array<i64: 1, 128>}, {pipeline_mode = #tpu.pipeline_mode<synchronous>, transform_indices = @transform_4, window_bounds = array<i64: 128, 51>}, {pipeline_mode = #tpu.pipeline_mode<synchronous>, transform_indices = @transform_5, window_bounds = array<i64: 1, 51>}, {transform_indices = @transform_6, window_bounds = array<i64: 64, 51>}]} {
    %c0 = arith.constant 0 : index
    %c0_0 = arith.constant 0 : index
    %0 = vector.load %arg1[%c0, %c0_0] : memref<64x51xf32, #tpu.memory_space<vmem>>, vector<64x51xf32>
    %c0_1 = arith.constant 0 : index
    %c0_2 = arith.constant 0 : index
    %1 = vector.load %arg2[%c0_1, %c0_2] : memref<64x51xf32, #tpu.memory_space<vmem>>, vector<64x51xf32>
    %2 = arith.addf %0, %1 : vector<64x51xf32>
    %c0_3 = arith.constant 0 : index
    %c0_4 = arith.constant 0 : index
    %3 = vector.load %arg3[%c0_3, %c0_4] : memref<51x128xf32, #tpu.memory_space<vmem>>, vector<51x128xf32>
    %cst = arith.constant dense<0.000000e+00> : vector<64x128xf32>
    %4 = tpu.matmul %2, %3, %cst {dimension_numbers = #tpu.dot_dimension_numbers<[1], [0], [0], [1], [0, 0, 1, 1], [], []>} : vector<64x51xf32>, vector<51x128xf32>, vector<64x128xf32> -> vector<64x128xf32>
    %c0_5 = arith.constant 0 : index
    %c0_6 = arith.constant 0 : index
    %5 = vector.load %arg4[%c0_5, %c0_6] : memref<1x128xf32, #tpu.memory_space<vmem>>, vector<1x128xf32>
    %6 = vector.broadcast %5 : vector<1x128xf32> to vector<64x128xf32>
    %7 = arith.addf %4, %6 : vector<64x128xf32>
    %cst_7 = arith.constant 0.000000e+00 : f32
    %8 = vector.broadcast %cst_7 : f32 to vector<64x128xf32>
    %9 = arith.maximumf %7, %8 : vector<64x128xf32>
    %c0_8 = arith.constant 0 : index
    %c0_9 = arith.constant 0 : index
    %10 = vector.load %arg5[%c0_8, %c0_9] : memref<128x51xf32, #tpu.memory_space<vmem>>, vector<128x51xf32>
    %cst_10 = arith.constant dense<0.000000e+00> : vector<64x51xf32>
    %11 = tpu.matmul %9, %10, %cst_10 {dimension_numbers = #tpu.dot_dimension_numbers<[1], [0], [0], [1], [0, 0, 1, 1], [], []>} : vector<64x128xf32>, vector<128x51xf32>, vector<64x51xf32> -> vector<64x51xf32>
    %c0_11 = arith.constant 0 : index
    %c0_12 = arith.constant 0 : index
    %12 = vector.load %arg6[%c0_11, %c0_12] : memref<1x51xf32, #tpu.memory_space<vmem>>, vector<1x51xf32>
    %13 = vector.broadcast %12 : vector<1x51xf32> to vector<64x51xf32>
    %14 = arith.addf %11, %13 : vector<64x51xf32>
    %c0_13 = arith.constant 0 : index
    %c0_14 = arith.constant 0 : index
    %15 = vector.load %arg7[%c0_13, %c0_14] : memref<64x51xf32, #tpu.memory_space<vmem>>, vector<64x51xf32>
    tpu.vector_store %arg7[%c0_13, %c0_14], %14 {strides = array<i32>} : memref<64x51xf32, #tpu.memory_space<vmem>>, vector<64x51xf32>,
    return
  }
  func.func @transform_0(%arg0: i32) -> (i32, i32) {
    %c0_i32 = arith.constant 0 : i32
    %c0_i32_0 = arith.constant 0 : i32
    return %arg0, %c0_i32 : i32, i32
  }
  func.func @transform_1(%arg0: i32) -> (i32, i32) {
    %c0_i32 = arith.constant 0 : i32
    %c0_i32_0 = arith.constant 0 : i32
    return %arg0, %c0_i32 : i32, i32
  }
  func.func @transform_2(%arg0: i32) -> (i32, i32) {
    %c0_i32 = arith.constant 0 : i32
    %c0_i32_0 = arith.constant 0 : i32
    %c0_i32_1 = arith.constant 0 : i32
    return %c0_i32, %c0_i32_0 : i32, i32
  }
  func.func @transform_3(%arg0: i32) -> (i32, i32) {
    %c0_i32 = arith.constant 0 : i32
    %c0_i32_0 = arith.constant 0 : i32
    %c0_i32_1 = arith.constant 0 : i32
    return %c0_i32, %c0_i32_0 : i32, i32
  }
  func.func @transform_4(%arg0: i32) -> (i32, i32) {
    %c0_i32 = arith.constant 0 : i32
    %c0_i32_0 = arith.constant 0 : i32
    %c0_i32_1 = arith.constant 0 : i32
    return %c0_i32, %c0_i32_0 : i32, i32
  }
  func.func @transform_5(%arg0: i32) -> (i32, i32) {
    %c0_i32 = arith.constant 0 : i32
    %c0_i32_0 = arith.constant 0 : i32
    %c0_i32_1 = arith.constant 0 : i32
    return %c0_i32, %c0_i32_0 : i32, i32
  }
  func.func @transform_6(%arg0: i32) -> (i32, i32) {
    %c0_i32 = arith.constant 0 : i32
    %c0_i32_0 = arith.constant 0 : i32
    return %arg0, %c0_i32 : i32, i32
  }
}

</mosaic_0001>

<bundles_post_ra>
// kernel: tpu_custom_call.1
= control target key start
LH: loop header
LB: loop body
LE: loop exit
PB: predicated region body
PF: predicated region fallthrough
CT: control target
= control target key end

     0   :  { %s889_s21 = smov 0   ;;  %s1027_s0 = inlined_call_operand.vmem [shape: f32[128,51], index: 0, kind: input, shape index: {}]   ;;  %s1028_s1 = inlined_call_operand.vmem [shape: f32[128,51], index: 1, kind: input, shape index: {}]   ;;  %s1029_s2 = inlined_call_operand.vmem [shape: f32[51,128], index: 2, kind: input, shape index: {}]   ;;  %s1030_s3 = inlined_call_operand.vmem [shape: f32[1,128], index: 3, kind: input, shape index: {}]   ;;  %s1031_s4 = inlined_call_operand.vmem [shape: f32[128,51], index: 4, kind: input, shape index: {}]   ;;  %s1032_s5 = inlined_call_operand.vmem [shape: f32[1,51], index: 5, kind: input, shape index: {}]   ;;  %s1033_s6 = inlined_call_operand.vmem [shape: f32[128,51], index: 6, kind: output, shape index: {}]  }
   0x1 LB: > { %s661_s22 = sadd.s32 4294967295, %s852_s21   ;;  %p665_p0 = scmp.ge.s32.totalorder %s852_s21, 1  ;;  %s852_s21 = sphi %s889_s21, %s16_s21  }
   0x2   : > { %p224_p1 = scmp.lt.s32.totalorder %s852_s21, 3 }
   0x4   : > { %p225_p2 = pnand %p665_p0, %p224_p1 }
   0x5   : > { %v301_v0 = vld [vmem:[%s1029_s2] sm:$0xff] (!%p225_p2)  ;;  %v302_v1 = vld [vmem:[%s1029_s2 + $0x8] sm:$0xff] (!%p225_p2)  ;;  %v303_v2 = vld [vmem:[%s1029_s2 + $0x10] sm:$0xff] (!%p225_p2)  ;;  %s666_s29 = sshll.u32 (!%p225_p2), %s661_s22, 3  ;;  %vm315_vm0 = vcmask (!%p225_p2), 416768   ;;  %vm340_vm1 = vcmask (!%p225_p2), 1042432  }
   0x6   : > { %228 = sbr.rel (%p225_p2) target bundleno = 468 (0x1d4), region = 44  ;;  %v794_v3 = vpack.c.bf16 (!%p225_p2), %v302_v1, %v301_v0  ;;  %v304_v4 = vld [vmem:[%s1029_s2 + $0x18] sm:$0xff] (!%p225_p2)  ;;  %v305_v5 = vld [vmem:[%s1029_s2 + $0x20] sm:$0xff] (!%p225_p2)  ;;  %p260_p3 = scmp.lt.s32.totalorder (!%p225_p2), %s666_s29, 15  ;;  %v306_v7 = vld [vmem:[%s1029_s2 + $0x28] sm:$0xff] (!%p225_p2) }
   0x7   : > { %v798_v6 = vpack.c.bf16 (!%p225_p2), %v304_v4, %v303_v2  ;;  %v457_v8 = vld [vmem:[%s1031_s4] sm:$0xff] (!%p225_p2)  ;;  %v458_v9 = vld [vmem:[%s1031_s4 + $0x8] sm:$0xff] (!%p225_p2)  ;;  %v459_v11 = vld [vmem:[%s1031_s4 + $0x10] sm:$0xff] (!%p225_p2)  ;;  %v802_v16 = vpack.c.bf16 (!%p225_p2), %v306_v7, %v305_v5 }
   0x8   : > { %795 = vmatprep.subr.bf16.mxu0 (!%p225_p2), %v794_v3  ;;  %v806_v10 = vpack.c.bf16 (!%p225_p2), %v458_v9, %v457_v8  ;;  %v460_v12 = vld [vmem:[%s1031_s4 + $0x18] sm:$0xff] (!%p225_p2)  ;;  %v461_v14 = vld [vmem:[%s1031_s4 + $0x20] sm:$0xff] (!%p225_p2)  ;;  %v462_v15 = vld [vmem:[%s1031_s4 + $0x28] sm:$0xff] (!%p225_p2) }
   0x9   : > { %797 = vmatpush3.bf16.msra.mxu0 (!%p225_p2), %v794_v3  ;;  %v810_v13 = vpack.c.bf16 (!%p225_p2), %v460_v12, %v459_v11  ;;  %v814_v19 = vpack.c.bf16 (!%p225_p2), %v462_v15, %v461_v14  ;;  %v463_v21 = vld [vmem:[%s1031_s4 + $0x30] sm:$0xff] (!%p225_p2)  ;;  %v464_v22 = vld [vmem:[%s1031_s4 + $0x38] sm:$0xff] (!%p225_p2)  ;;  %v465_v29 = vld [vmem:[%s1031_s4 + $0x40] sm:$0xff] (!%p225_p2) }
   0xa   : > { %799 = vmatprep.subr.bf16.mxu0 (!%p225_p2), %v798_v6  ;;  %807 = vmatprep.subr.bf16.mxu1 (!%p225_p2), %v806_v10  ;;  %v307_v23 = vld [vmem:[%s1029_s2 + $0x30] sm:$0x7] (!%p225_p2)  ;;  %v818_v28 = vpack.c.bf16 (!%p225_p2), %v464_v22, %v463_v21  ;;  %v466_v30 = vld [vmem:[%s1031_s4 + $0x48] sm:$0xff] (!%p225_p2)  ;;  %v468_v39 = vld [vmem:[%s1031_s4 + $0x58] sm:$0xff] (!%p225_p2) }
   0xb   : > { %809 = vmatpush3.bf16.msra.mxu1 (!%p225_p2), %v806_v10  ;;  %v822_v37 = vpack.c.bf16 (!%p225_p2), %v466_v30, %v465_v29  ;;  %v467_v38 = vld [vmem:[%s1031_s4 + $0x50] sm:$0xff] (!%p225_p2)  ;;  %v469_v47 = vld [vmem:[%s1031_s4 + $0x60] sm:$0xff] (!%p225_p2)  ;;  %v470_v48 = vld [vmem:[%s1031_s4 + $0x68] sm:$0xff] (!%p225_p2) }
   0xc   : > { %811 = vmatprep.subr.bf16.mxu1 (!%p225_p2), %v810_v13  ;;  %v826_v46 = vpack.c.bf16 (!%p225_p2), %v468_v39, %v467_v38  ;;  %v830_v53 = vpack.c.bf16 (!%p225_p2), %v470_v48, %v469_v47  ;;  %v471_v55 = vld [vmem:[%s1031_s4 + $0x70] sm:$0xff] (!%p225_p2)  ;;  %v472_v56 = vld [vmem:[%s1031_s4 + $0x78] sm:$0xff] (!%p225_p2)  ;;  %v672_v58 = vld [vmem:[%s1030_s3] ss:$0 sm:$0xff] (!%p225_p2) }
   0xd   : > { %s1035_s29 = smov (!%p260_p3, %s666_s29), 15  ;;  %801 = vmatpush3.bf16.msra.mxu0 %v798_v6  ;;  %v834_v57 = vpack.c.bf16 %v472_v56, %v471_v55 }
   0xe   : > { %s933_s25 = sshll.u32 %s1035_s29, 3  ;;  %803 = vmatprep.subr.bf16.mxu0 %v802_v16 }
   0xf   : > { %s939_s28 = scalar_lea.vmem %s1027_s0, %s933_s25  ;;  %s945_s8 = scalar_lea.vmem %s1028_s1, %s933_s25  ;;  %813 = vmatpush3.bf16.msra.mxu1 %v810_v13 }
  0x10   : > { %v277_v17 = vld [vmem:[%s939_s28] sm:$0xff]  ;;  %v278_v24 = vld [vmem:[%s939_s28 + $0x8] sm:$0xff]  ;;  %v279_v26 = vld [vmem:[%s939_s28 + $0x10] sm:$0xff]  ;;  %815 = vmatprep.subr.bf16.mxu1 %v814_v19  ;;  %s275_s14 = scalar_lea.vmem %s1033_s6, %s933_s25 }
  0x11   : > { %v285_v18 = vld [vmem:[%s945_s8] sm:$0xff]  ;;  %v286_v25 = vld [vmem:[%s945_s8 + $0x8] sm:$0xff]  ;;  %v287_v27 = vld [vmem:[%s945_s8 + $0x10] sm:$0xff]  ;;  %805 = vmatpush3.bf16.msra.mxu0 %v802_v16 }
  0x12   : > { %v293_v20 = vadd.f32 %v285_v18, %v277_v17  ;;  %736 = vmatprep.subr.msk.mxu0 %vm340_vm1, %v307_v23  ;;  %v294_v31 = vadd.f32 %v286_v25, %v278_v24  ;;  %v295_v32 = vadd.f32 %v287_v27, %v279_v26  ;;  %v280_v33 = vld [vmem:[%s939_s28 + $0x18] sm:$0xff]  ;;  %v281_v35 = vld [vmem:[%s939_s28 + $0x20] sm:$0xff]  ;;  %v282_v42 = vld [vmem:[%s939_s28 + $0x28] sm:$0xff] }
  0x13   : > { %v288_v34 = vld [vmem:[%s945_s8 + $0x18] sm:$0xff]  ;;  %817 = vmatpush3.bf16.msra.mxu1 %v814_v19  ;;  %v289_v36 = vld [vmem:[%s945_s8 + $0x20] sm:$0xff]  ;;  %v290_v43 = vld [vmem:[%s945_s8 + $0x28] sm:$0xff] }
  0x14   : > { %738 = vmatprep.mubr.msk.f32.mxu0 %vm315_vm0, %v293_v20  ;;  %819 = vmatprep.subr.bf16.mxu1 %v818_v28  ;;  %v296_v40 = vadd.f32 %v288_v34, %v280_v33  ;;  %v297_v41 = vadd.f32 %v289_v36, %v281_v35  ;;  %v283_v44 = vld [vmem:[%s939_s28 + $0x30] sm:$0xff]  ;;  %v298_v49 = vadd.f32 %v290_v43, %v282_v42  ;;  %v284_v51 = vld [vmem:[%s939_s28 + $0x38] sm:$0xff]  ;;  %v682_v19 = vld [vmem:[%s1032_s5] ss:$0 sm:$0xff] }
  0x15   : > { %737 = vmatpush3.msk.msra.mxu0 %vm340_vm1, %v307_v23  ;;  %v291_v45 = vld [vmem:[%s945_s8 + $0x30] sm:$0xff]  ;;  %v292_v52 = vld [vmem:[%s945_s8 + $0x38] sm:$0xff] }
  0x16   : > { %739 = vmatmul.mubr.msk.f32.vlgmr.msra.gmra.mrb[0].mxu0 %vm315_vm0, %v294_v31  ;;  %v299_v50 = vadd.f32 %v291_v45, %v283_v44  ;;  %v300_v54 = vadd.f32 %v292_v52, %v284_v51 }
  0x17   : > { %741 = vmatprep.mubr.msk.f32.mxu0 %vm315_vm0, %v295_v32  ;;  %821 = vmatpush3.bf16.msra.mxu1 %v818_v28 }
  0x18   : > { %823 = vmatprep.subr.bf16.mxu1 %v822_v37 }
  0x1a   : > { %742 = vmatmul.mubr.msk.f32.gmra.mrb[2].mxu0 %vm315_vm0, %v296_v40 }
  0x1b   : > { %744 = vmatprep.mubr.msk.f32.mxu0 %vm315_vm0, %v297_v41  ;;  %825 = vmatpush3.bf16.msra.mxu1 %v822_v37 }
  0x1c   : > { %827 = vmatprep.subr.bf16.mxu1 %v826_v46 }
  0x1e   : > { %745 = vmatmul.mubr.msk.f32.gmra.mrb[4].mxu0 %vm315_vm0, %v298_v49 }
  0x1f   : > { %747 = vmatprep.mubr.msk.f32.mxu0 %vm315_vm0, %v299_v50  ;;  %829 = vmatpush3.bf16.msra.mxu1 %v826_v46 }
  0x20   : > { %831 = vmatprep.subr.bf16.mxu1 %v830_v53 }
  0x22   : > { %748 = vmatmul.mubr.msk.f32.gmra.mrb[6].mxu0 %vm315_vm0, %v300_v54 }
  0x23   : > { %833 = vmatpush3.bf16.msra.mxu1 %v830_v53 }
  0x24   : > { %835 = vmatprep.subr.bf16.mxu1 %v834_v57 }
  0x27   : > { %837 = vmatpush3.bf16.msra.mxu1 %v834_v57 }
  0xe9   : > { %v740_v59 = vpop.f32.mrb[0].mxu0 }
  0xea   : > { %v416_v60 = vadd.f32 %v740_v59, %v672_v58  ;;  %v410_v61 = vpop.f32.mrb[1].mxu0 }
  0xeb   : > { %v411_v62 = vadd.f32 %v672_v58, %v410_v61 }
  0xec   : > { %v450_v1 = vmax.f32 %v416_v60, 0.0 }
  0xed   : > { %v743_v63 = vpop.f32.mrb[2].mxu0  ;;  %v449_v0 = vmax.f32 %v411_v62, 0.0 }
  0xee   : > { %v426_v2 = vadd.f32 %v743_v63, %v672_v58  ;;  %v420_v3 = vpop.f32.mrb[3].mxu0 }
  0xef   : > { %v421_v4 = vadd.f32 %v672_v58, %v420_v3  ;;  %782 = vmatprep.mubr.f32.mxu1 %v449_v0 }
  0xf0   : > { %783 = vmatmul.mubr.f32.vlgmr.msra.gmra.mrb[0].mxu1 %v450_v1  ;;  %v452_v7 = vmax.f32 %v426_v2, 0.0 }
  0xf1   : > { %v451_v5 = vmax.f32 %v421_v4, 0.0  ;;  %v746_v6 = vpop.f32.mrb[4].mxu0 }
  0xf2   : > { %v436_v8 = vadd.f32 %v746_v6, %v672_v58  ;;  %v430_v9 = vpop.f32.mrb[5].mxu0 }
  0xf3   : > { %v431_v10 = vadd.f32 %v672_v58, %v430_v9  ;;  %785 = vmatprep.mubr.f32.mxu1 %v451_v5 }
  0xf4   : > { %786 = vmatmul.mubr.f32.gmra.mrb[2].mxu1 %v452_v7  ;;  %v454_v13 = vmax.f32 %v436_v8, 0.0 }
  0xf5   : > { %v453_v11 = vmax.f32 %v431_v10, 0.0  ;;  %v749_v12 = vpop.f32.mrb[6].mxu0 }
  0xf6   : > { %v446_v14 = vadd.f32 %v749_v12, %v672_v58  ;;  %v440_v15 = vpop.f32.mrb[7].mxu0 }
  0xf7   : > { %v441_v16 = vadd.f32 %v672_v58, %v440_v15  ;;  %788 = vmatprep.mubr.f32.mxu1 %v453_v11 }
  0xf8   : > { %789 = vmatmul.mubr.f32.gmra.mrb[4].mxu1 %v454_v13  ;;  %v456_v18 = vmax.f32 %v446_v14, 0.0 }
  0xf9   : > { %v455_v17 = vmax.f32 %v441_v16, 0.0 }
  0xfb   : > { %791 = vmatprep.mubr.f32.mxu1 %v455_v17 }
  0xfc   : > { %792 = vmatmul.mubr.f32.gmra.mrb[6].mxu1 %v456_v18 }
 0x1c3   : > { %v784_v20 = vpop.f32.mrb[0].mxu1 }
 0x1c4   : > { %v552_v21 = vadd.f32 %v784_v20, %v682_v19  ;;  %v546_v22 = vpop.f32.mrb[1].mxu1 }
 0x1c5   : > { %v547_v23 = vadd.f32 %v682_v19, %v546_v22 }
 0x1c6   : > { %586 = vst.msk [vmem:[%s275_s14 + $0x8] sm:$0xff] %vm315_vm0, %v552_v21 }
 0x1c7   : > { %585 = vst.msk [vmem:[%s275_s14] sm:$0xff] %vm315_vm0, %v547_v23  ;;  %v787_v24 = vpop.f32.mrb[2].mxu1 }
 0x1c8   : > { %v562_v25 = vadd.f32 %v787_v24, %v682_v19  ;;  %v556_v26 = vpop.f32.mrb[3].mxu1 }
 0x1c9   : > { %v557_v27 = vadd.f32 %v682_v19, %v556_v26 }
 0x1ca   : > { %588 = vst.msk [vmem:[%s275_s14 + $0x18] sm:$0xff] %vm315_vm0, %v562_v25 }
 0x1cb   : > { %587 = vst.msk [vmem:[%s275_s14 + $0x10] sm:$0xff] %vm315_vm0, %v557_v27  ;;  %v790_v28 = vpop.f32.mrb[4].mxu1 }
 0x1cc   : > { %v572_v29 = vadd.f32 %v790_v28, %v682_v19  ;;  %v566_v30 = vpop.f32.mrb[5].mxu1 }
 0x1cd   : > { %v567_v31 = vadd.f32 %v682_v19, %v566_v30 }
 0x1ce   : > { %590 = vst.msk [vmem:[%s275_s14 + $0x28] sm:$0xff] %vm315_vm0, %v572_v29 }
 0x1cf   : > { %589 = vst.msk [vmem:[%s275_s14 + $0x20] sm:$0xff] %vm315_vm0, %v567_v31  ;;  %v793_v32 = vpop.f32.mrb[6].mxu1 }
 0x1d0   : > { %v582_v33 = vadd.f32 %v793_v32, %v682_v19  ;;  %v576_v34 = vpop.f32.mrb[7].mxu1 }
 0x1d1   : > { %v577_v35 = vadd.f32 %v682_v19, %v576_v34 }
 0x1d2   : > { %592 = vst.msk [vmem:[%s275_s14 + $0x38] sm:$0xff] %vm315_vm0, %v582_v33 }
 0x1d3   : > { %591 = vst.msk [vmem:[%s275_s14 + $0x30] sm:$0xff] %vm315_vm0, %v577_v35 }
 0x1d4 PF: > { %s16_s21 = sadd.s32 1, %s852_s21  }
 0x1d5   : > { %p13_p4 = scmp.ge.s32.totalorder %s16_s21, 4  }
 0x1d7   :  { %15 = sbr.rel (!%p13_p4) target bundleno = 1 (0x1), region = 77 }

</bundles_post_ra>
